<compile_context>
chip_gen: v7x
topology: tpu7x:2x2x1
jax: 0.10.0
libtpu: 0.0.40
codegen_flags: <defaults>
</compile_context>

<pallas_src>
import math

import jax
import jax.numpy as jnp
from jax.experimental import pallas as pl
from jax.experimental.pallas import tpu as pltpu

HIDDEN = 256


def _round_up(x, m):
    return (x + m - 1) // m * m


def _vmem_budget():
    """Pick (max batch tile, scoped VMEM limit) from the chip's VMEM capacity."""
    try:
        info = pltpu.get_tpu_info()
        cap = getattr(info, "vmem_capacity_bytes", 64 * 1024 * 1024)
    except Exception:  # pragma: no cover - conservative fallback
        cap = 64 * 1024 * 1024
    if cap >= 100 * 1024 * 1024:          # v5e / v6e: 128 MiB VMEM
        return 8192, 96 * 1024 * 1024
    return 4096, 48 * 1024 * 1024         # v7x (64 MiB) or unknown


TB_MAX, VMEM_LIMIT = _vmem_budget()


def _pick_batch_tiling(B, tb_max):
    """Balanced batch tiling: tb (mult of 16), num_tiles, padded batch."""
    bp = _round_up(B, 16)
    n_tiles = max(1, pl.cdiv(bp, tb_max))
    if bp >= 32:
        n_tiles = max(n_tiles, 2)         # >=2 grid steps -> both v7x TCs busy
    tb = _round_up(pl.cdiv(bp, n_tiles), 16)
    num_tiles = pl.cdiv(bp, tb)
    return tb, num_tiles, num_tiles * tb


def critic_kernel(x_ref, w1_ref, b1_ref, w2_ref, b2_ref, w3_ref, b3_ref, o_ref):
    # fc1: single merged matmul over the pre-concatenated bf16 input.
    h1 = jnp.dot(x_ref[...], w1_ref[...], preferred_element_type=jnp.float32)
    h1 = jnp.maximum(h1 + b1_ref[...], 0.0)                    # f32 bias + ReLU

    # fc2
    h2 = jnp.dot(h1.astype(jnp.bfloat16), w2_ref[...],
                 preferred_element_type=jnp.float32)
    h2 = jnp.maximum(h2 + b2_ref[...], 0.0)

    # fc3 (N = 1): VPU multiply; pre-add the two 128-lane halves on the VPU,
    # then a single 128-lane XLU reduction (half the XLU slot pressure).
    hw = h2 * w3_ref[...]                                       # [TB, 256] f32
    half = HIDDEN // 2
    q = jnp.sum(hw[:, :half] + hw[:, half:], axis=-1) + b3_ref[0]   # [TB]
    o_ref[...] = q.reshape(1, 1, -1).astype(o_ref.dtype)        # lane-dense store


def prepare_critic_params(params):
    """One-time parameter prep (hoisted out of the jitted forward):
    bf16 weights for the MXU, f32 biases / fc3 row for the VPU."""
    w1, b1, w2, b2, w3, b3 = params
    return (
        w1.astype(jnp.bfloat16),                       # (D_in, 256)
        b1.reshape(1, HIDDEN).astype(jnp.float32),     # (1, 256)
        w2.astype(jnp.bfloat16),                       # (256, 256)
        b2.reshape(1, HIDDEN).astype(jnp.float32),     # (1, 256)
        w3.reshape(1, HIDDEN).astype(jnp.float32),     # (1, 256) fc3 row (VPU)
        b3.reshape(1).astype(jnp.float32),             # (1,)  scalar -> SMEM
    )


def critic_forward(state, action, prep, *, tb=None):
    """Pallas equivalent of Critic.forward(state, action). Returns [B, 1] f32."""
    w1, b1, w2, b2, w3r, b3r = prep
    B = state.shape[0]
    d_in = state.shape[1] + action.shape[1]

    # Merge the concat here (tiny: d_in floats/row) and pre-cast to bf16 so the
    # only per-row HBM stream is half-width.
    x = jnp.concatenate([state, action], axis=-1).astype(jnp.bfloat16)

    if tb is None:
        tb, num_tiles, bp = _pick_batch_tiling(B, TB_MAX)
    else:
        tb = _round_up(tb, 16)
        bp = _round_up(B, tb)
        num_tiles = bp // tb
    if bp != B:  # pad the last batch tile; sliced off after the kernel
        x = jnp.pad(x, ((0, bp - B), (0, 0)))

    const2d = lambda i: (0, 0)
    out = pl.pallas_call(
        critic_kernel,
        grid=(num_tiles,),
        out_shape=jax.ShapeDtypeStruct((num_tiles, 1, tb), jnp.float32),
        in_specs=[
            pl.BlockSpec((tb, d_in), lambda i: (i, 0)),        # x tile (streamed)
            pl.BlockSpec((d_in, HIDDEN), const2d),             # W1      (resident)
            pl.BlockSpec((1, HIDDEN), const2d),                # b1      (resident)
            pl.BlockSpec((HIDDEN, HIDDEN), const2d),           # W2      (resident)
            pl.BlockSpec((1, HIDDEN), const2d),                # b2      (resident)
            pl.BlockSpec((1, HIDDEN), const2d),                # W3 row  (resident)
            pl.BlockSpec(memory_space=pltpu.MemorySpace.SMEM), # b3 scalar
        ],
        out_specs=pl.BlockSpec((1, 1, tb), lambda i: (i, 0, 0)),
        compiler_params=pltpu.CompilerParams(
            dimension_semantics=("parallel",),     # megacore split on v7x
            vmem_limit_bytes=VMEM_LIMIT,
        ),
    )(x, w1, b1, w2, b2, w3r, b3r)

    return out.reshape(bp, 1)[:B]


def xavier_uniform(key, fan_in, fan_out, dtype=jnp.float32):
    # Matches torch.nn.init.xavier_uniform_ (gain=1): U(-a, a), a = sqrt(6/(fan_in+fan_out))
    a = math.sqrt(6.0 / (fan_in + fan_out))
    # Drawn directly in [in, out] layout (transpose of torch's [out, in]);
    # the distribution is symmetric so semantics are identical.
    return jax.random.uniform(key, (fan_in, fan_out), dtype=dtype, minval=-a, maxval=a)


def init_critic_params(key, state_dim, action_dim):
    d_in = state_dim + action_dim
    k1, k2, k3 = jax.random.split(key, 3)
    w1 = xavier_uniform(k1, d_in, HIDDEN)
    b1 = jnp.zeros((1, HIDDEN), jnp.float32)
    w2 = xavier_uniform(k2, HIDDEN, HIDDEN)
    b2 = jnp.zeros((1, HIDDEN), jnp.float32)
    w3 = xavier_uniform(k3, HIDDEN, 1)
    b3 = jnp.zeros((1, 1), jnp.float32)
    return (w1, b1, w2, b2, w3, b3)


def critic_reference_f32(state, action, params):
    """Pure-f32 reference (PyTorch semantics)."""
    w1, b1, w2, b2, w3, b3 = params
    q = jnp.concatenate([state, action], axis=-1)
    q = jnp.maximum(q @ w1 + b1, 0.0)
    q = jnp.maximum(q @ w2 + b2, 0.0)
    return q @ w3 + b3


def critic_reference_mixed(state, action, params):
    """Reference mirroring the kernel's mixed precision (bf16 MXU, f32 accum/elementwise)."""
    w1, b1, w2, b2, w3, b3 = params
    bf = jnp.bfloat16
    q = jnp.concatenate([state, action], axis=-1)
    h1 = jnp.dot(q.astype(bf), w1.astype(bf), preferred_element_type=jnp.float32)
    h1 = jnp.maximum(h1 + b1, 0.0)
    h2 = jnp.dot(h1.astype(bf), w2.astype(bf), preferred_element_type=jnp.float32)
    h2 = jnp.maximum(h2 + b2, 0.0)
    return jnp.sum(h2 * w3.reshape(1, -1), axis=-1, keepdims=True) + b3


if __name__ == "__main__":
    key = jax.random.PRNGKey(0)
    k_param, k_state, k_action = jax.random.split(key, 3)

    batch = 8
    state_dim = 12
    action_dim = 4

    params = init_critic_params(k_param, state_dim, action_dim)
    prep = prepare_critic_params(params)     # one-time weight prep (bf16, reshapes)
    state = jax.random.normal(k_state, (batch, state_dim), jnp.float32)
    action = jax.random.normal(k_action, (batch, action_dim), jnp.float32)

    critic_fn = jax.jit(critic_forward)
    out = jax.block_until_ready(critic_fn(state, action, prep))

    ref_mixed = critic_reference_mixed(state, action, params)
    ref_f32 = critic_reference_f32(state, action, params)

    assert out.shape == (batch, 1), out.shape
    # Tight check vs a reference with matching (bf16-input) matmul precision.
    assert jnp.allclose(out, ref_mixed, atol=1e-3, rtol=1e-3), (out, ref_mixed)
    # Loose check vs the pure-f32 PyTorch-style reference (bf16 MXU inputs).
    assert jnp.allclose(out, ref_f32, atol=5e-2, rtol=5e-2), (out, ref_f32)
    print("KERNEL_OK")
</pallas_src>

<mosaic_0001>
module attributes {stable_mosaic.version = 11 : i64} {
  func.func @critic_kernel(%arg0: i32, %arg1: memref<16x16xbf16, #tpu.memory_space<vmem>>, %arg2: memref<16x256xbf16, #tpu.memory_space<vmem>>, %arg3: memref<1x256xf32, #tpu.memory_space<vmem>>, %arg4: memref<256x256xbf16, #tpu.memory_space<vmem>>, %arg5: memref<1x256xf32, #tpu.memory_space<vmem>>, %arg6: memref<1x256xf32, #tpu.memory_space<vmem>>, %arg7: memref<1xf32, #tpu.memory_space<smem>>, %arg8: memref<1x1x16xf32, #tpu.memory_space<vmem>>) attributes {dimension_semantics = [#tpu.dimension_semantics<parallel>], iteration_bounds = array<i64: 1>, scalar_prefetch = 0 : i64, scratch_operands = 0 : i64, tpu.core_type = #tpu.core_type<tc>, window_params = [{transform_indices = @transform_0, window_bounds = array<i64: 16, 16>}, {pipeline_mode = #tpu.pipeline_mode<synchronous>, transform_indices = @transform_1, window_bounds = array<i64: 16, 256>}, {pipeline_mode = #tpu.pipeline_mode<synchronous>, transform_indices = @transform_2, window_bounds = array<i64: 1, 256>}, {pipeline_mode = #tpu.pipeline_mode<synchronous>, transform_indices = @transform_3, window_bounds = array<i64: 256, 256>}, {pipeline_mode = #tpu.pipeline_mode<synchronous>, transform_indices = @transform_4, window_bounds = array<i64: 1, 256>}, {pipeline_mode = #tpu.pipeline_mode<synchronous>, transform_indices = @transform_5, window_bounds = array<i64: 1, 256>}, {transform_indices = @transform_6, window_bounds = array<i64: 1>}, {transform_indices = @transform_7, window_bounds = array<i64: 1, 1, 16>}]} {
    %c0 = arith.constant 0 : index
    %c0_0 = arith.constant 0 : index
    %0 = vector.load %arg1[%c0, %c0_0] : memref<16x16xbf16, #tpu.memory_space<vmem>>, vector<16x16xbf16>
    %c0_1 = arith.constant 0 : index
    %c0_2 = arith.constant 0 : index
    %1 = vector.load %arg2[%c0_1, %c0_2] : memref<16x256xbf16, #tpu.memory_space<vmem>>, vector<16x256xbf16>
    %cst = arith.constant dense<0.000000e+00> : vector<16x256xf32>
    %2 = tpu.matmul %0, %1, %cst {dimension_numbers = #tpu.dot_dimension_numbers<[1], [0], [0], [1], [0, 0, 1, 1], [], []>} : vector<16x16xbf16>, vector<16x256xbf16>, vector<16x256xf32> -> vector<16x256xf32>
    %c0_3 = arith.constant 0 : index
    %c0_4 = arith.constant 0 : index
    %3 = vector.load %arg3[%c0_3, %c0_4] : memref<1x256xf32, #tpu.memory_space<vmem>>, vector<1x256xf32>
    %4 = vector.broadcast %3 : vector<1x256xf32> to vector<16x256xf32>
    %5 = arith.addf %2, %4 : vector<16x256xf32>
    %cst_5 = arith.constant 0.000000e+00 : f32
    %6 = vector.broadcast %cst_5 : f32 to vector<16x256xf32>
    %7 = arith.maximumf %5, %6 : vector<16x256xf32>
    %8 = arith.truncf %7 : vector<16x256xf32> to vector<16x256xbf16>
    %c0_6 = arith.constant 0 : index
    %c0_7 = arith.constant 0 : index
    %9 = vector.load %arg4[%c0_6, %c0_7] : memref<256x256xbf16, #tpu.memory_space<vmem>>, vector<256x256xbf16>
    %cst_8 = arith.constant dense<0.000000e+00> : vector<16x256xf32>
    %10 = tpu.matmul %8, %9, %cst_8 {dimension_numbers = #tpu.dot_dimension_numbers<[1], [0], [0], [1], [0, 0, 1, 1], [], []>} : vector<16x256xbf16>, vector<256x256xbf16>, vector<16x256xf32> -> vector<16x256xf32>
    %c0_9 = arith.constant 0 : index
    %c0_10 = arith.constant 0 : index
    %11 = vector.load %arg5[%c0_9, %c0_10] : memref<1x256xf32, #tpu.memory_space<vmem>>, vector<1x256xf32>
    %12 = vector.broadcast %11 : vector<1x256xf32> to vector<16x256xf32>
    %13 = arith.addf %10, %12 : vector<16x256xf32>
    %cst_11 = arith.constant 0.000000e+00 : f32
    %14 = vector.broadcast %cst_11 : f32 to vector<16x256xf32>
    %15 = arith.maximumf %13, %14 : vector<16x256xf32>
    %c0_12 = arith.constant 0 : index
    %c0_13 = arith.constant 0 : index
    %16 = vector.load %arg6[%c0_12, %c0_13] : memref<1x256xf32, #tpu.memory_space<vmem>>, vector<1x256xf32>
    %17 = vector.broadcast %16 : vector<1x256xf32> to vector<16x256xf32>
    %18 = arith.mulf %15, %17 : vector<16x256xf32>
    %19 = vector.extract_strided_slice %18 {offsets = [0, 0], sizes = [16, 128], strides = [1, 1]} : vector<16x256xf32> to vector<16x128xf32>
    %20 = vector.extract_strided_slice %18 {offsets = [0, 128], sizes = [16, 128], strides = [1, 1]} : vector<16x256xf32> to vector<16x128xf32>
    %21 = arith.addf %19, %20 : vector<16x128xf32>
    %cst_14 = arith.constant dense<0.000000e+00> : vector<16xf32>
    %22 = vector.multi_reduction <add>, %21, %cst_14 [1] : vector<16x128xf32> to vector<16xf32>
    %c0_15 = arith.constant 0 : index
    %23 = memref.load %arg7[%c0_15] : memref<1xf32, #tpu.memory_space<smem>>
    %24 = vector.broadcast %23 : f32 to vector<16xf32>
    %25 = arith.addf %22, %24 : vector<16xf32>
    %26 = vector.shape_cast %25 : vector<16xf32> to vector<1x1x16xf32>
    %c0_16 = arith.constant 0 : index
    %c0_17 = arith.constant 0 : index
    %c0_18 = arith.constant 0 : index
    %27 = vector.load %arg8[%c0_16, %c0_17, %c0_18] : memref<1x1x16xf32, #tpu.memory_space<vmem>>, vector<1x1x16xf32>
    tpu.vector_store %arg8[%c0_16, %c0_17, %c0_18], %26 {strides = array<i32>} : memref<1x1x16xf32, #tpu.memory_space<vmem>>, vector<1x1x16xf32>,
    return
  }
  func.func @transform_0(%arg0: i32) -> (i32, i32) {
    %c0_i32 = arith.constant 0 : i32
    %c0_i32_0 = arith.constant 0 : i32
    return %arg0, %c0_i32 : i32, i32
  }
  func.func @transform_1(%arg0: i32) -> (i32, i32) {
    %c0_i32 = arith.constant 0 : i32
    %c0_i32_0 = arith.constant 0 : i32
    %c0_i32_1 = arith.constant 0 : i32
    return %c0_i32, %c0_i32_0 : i32, i32
  }
  func.func @transform_2(%arg0: i32) -> (i32, i32) {
    %c0_i32 = arith.constant 0 : i32
    %c0_i32_0 = arith.constant 0 : i32
    %c0_i32_1 = arith.constant 0 : i32
    return %c0_i32, %c0_i32_0 : i32, i32
  }
  func.func @transform_3(%arg0: i32) -> (i32, i32) {
    %c0_i32 = arith.constant 0 : i32
    %c0_i32_0 = arith.constant 0 : i32
    %c0_i32_1 = arith.constant 0 : i32
    return %c0_i32, %c0_i32_0 : i32, i32
  }
  func.func @transform_4(%arg0: i32) -> (i32, i32) {
    %c0_i32 = arith.constant 0 : i32
    %c0_i32_0 = arith.constant 0 : i32
    %c0_i32_1 = arith.constant 0 : i32
    return %c0_i32, %c0_i32_0 : i32, i32
  }
  func.func @transform_5(%arg0: i32) -> (i32, i32) {
    %c0_i32 = arith.constant 0 : i32
    %c0_i32_0 = arith.constant 0 : i32
    %c0_i32_1 = arith.constant 0 : i32
    return %c0_i32, %c0_i32_0 : i32, i32
  }
  func.func @transform_6(%arg0: i32) -> i32 {
    %c0_i32 = arith.constant 0 : i32
    %c0_i32_0 = arith.constant 0 : i32
    return %c0_i32 : i32
  }
  func.func @transform_7(%arg0: i32) -> (i32, i32, i32) {
    %c0_i32 = arith.constant 0 : i32
    %c0_i32_0 = arith.constant 0 : i32
    %c0_i32_1 = arith.constant 0 : i32
    return %arg0, %c0_i32, %c0_i32_0 : i32, i32, i32
  }
}

</mosaic_0001>

<bundles_post_ra>
// kernel: critic_forward.1
= control target key start
LH: loop header
LB: loop body
LE: loop exit
PB: predicated region body
PF: predicated region fallthrough
CT: control target
= control target key end

     0   :  { %13 = vsyncpa [#allocation4], 0  ;;  %s542_s24 = smov [#allocation3]   ;;  %s622_s0 = inlined_call_operand.vmem [shape: bf16[16,16], index: 0, kind: input, shape index: {}]   ;;  %s623_s1 = inlined_call_operand.vmem [shape: bf16[16,256], index: 1, kind: input, shape index: {}]   ;;  %s624_s2 = inlined_call_operand.vmem [shape: f32[1,256], index: 2, kind: input, shape index: {}]   ;;  %s625_s3 = inlined_call_operand.hbm [shape: bf16[256,256], index: 3, kind: input, shape index: {}]   ;;  %s626_s4 = inlined_call_operand.vmem [shape: f32[1,256], index: 4, kind: input, shape index: {}]   ;;  %s627_s5 = inlined_call_operand.vmem [shape: f32[1,256], index: 5, kind: input, shape index: {}]   ;;  %s628_s6 = inlined_call_operand.<no memory space> [shape: f32[1], index: 6, kind: input, shape index: {}]   ;;  %s629_s7 = inlined_call_operand.vmem [shape: f32[1,1,16], index: 7, kind: output, shape index: {}]  }
   0x1   :  { %s25_s25 = sshll.u32 %s542_s24, 4  ;;  %s518_s28 = scalar_lea.hbm %s625_s3, 4096  ;;  %s26_s25 = int_to_ptr.vmem [resolvable:$true] %s25_s25 }
   0x2   :  { %p519_p0 = scmp.ne.s32.totalorder %s625_s3, %s518_s28  ;;  %p522_p1 = scmp.lt.u32.totalorder %s518_s28, %s625_s3 }
   0x4   :  { %p524_p2 = pnand %p522_p1, %p519_p0 }
   0x6   :  { %527 = shalt.err (!%p524_p2)
}
   0x7   :  { %s528_s10 = scalar_lea.vmem %s26_s25, 4096  ;;  %p533_p4 = scmp.lt.s32.totalorder %s26_s25, %s26_s25 }
   0x8   :  { %p529_p3 = scmp.ne.s32.totalorder %s26_s25, %s528_s10  ;;  %p534_p5 = scmp.lt.s32.totalorder %s528_s10, %s528_s10 }
   0xa   :  { %p535_p6 = por %p534_p5, %p533_p4 }
   0xc   :  { %p536_p7 = pnand %p535_p6, %p529_p3 }
   0xe   :  { %539 = shalt.err (!%p536_p7)
}
   0xf   :  { %s543_s11 = smov 128   ;;  %s544_s12 = smov 8  }
  0x10   :  { %31 = dma.hbm_to_vmem [thread:$0]  %s625_s3, 4096, %s26_s25, [#allocation4], %s543_s11, %s543_s11, %s544_s12  }
  0x11   :  { %540 = dma.done.wait [#allocation4], 4096  }
  0x12   :  { %541 = vsyncadd [#allocation4], 4294963200  ;;  %v545_v0 = vmov 0   ;;  %v466_v1 = vld [vmem:[%s623_s1 + $0x4] ss:$8 sps:$4 sm:$0xff]   ;;  %vm73_vm0 = vcmask 130048   ;;  %v48_v36 = vlaneseq }
  0x13   :  { %109 = vmatprep.mubr.bf16.mxu0 %v545_v0  ;;  %v468_v2 = vld [vmem:[%s623_s1] ss:$8 sps:$4 sm:$0xff]   ;;  %77 = vmatprep.subr.bf16.mxu0 %v466_v1  ;;  %v470_v4 = vld [vmem:[#allocation3 + $0x4] ss:$8 sps:$4 sm:$0xff]   ;;  %v473_v6 = vld [vmem:[#allocation3 + $0x14] ss:$8 sps:$4 sm:$0xff]  }
  0x14   :  { %v469_v3 = vld [vmem:[%s622_s0] sm:$0xff]   ;;  %78 = vmatpush1.bf16.msra.mxu0 %v468_v2  ;;  %330 = vmatprep.subr.bf16.mxu1 %v470_v4  ;;  %v475_v7 = vld [vmem:[#allocation3 + $0x10] ss:$8 sps:$4 sm:$0xff]   ;;  %v479_v10 = vld [vmem:[#allocation3 + $0x34] ss:$8 sps:$4 sm:$0xff]   ;;  %v49_v37 = vshrl.u32 %v48_v36, 7 }
  0x15   :  { %v472_v5 = vld [vmem:[#allocation3] ss:$8 sps:$4 sm:$0xff]   ;;  %v476_v8 = vld [vmem:[#allocation3 + $0x24] ss:$8 sps:$4 sm:$0xff]   ;;  %v481_v11 = vld [vmem:[#allocation3 + $0x30] ss:$8 sps:$4 sm:$0xff]  }
  0x16   :  { %331 = vmatpush1.bf16.msra.mxu1 %v472_v5  ;;  %v478_v9 = vld [vmem:[#allocation3 + $0x20] ss:$8 sps:$4 sm:$0xff]   ;;  %v482_v12 = vld [vmem:[#allocation3 + $0x44] ss:$8 sps:$4 sm:$0xff]   ;;  %v485_v14 = vld [vmem:[#allocation3 + $0x54] ss:$8 sps:$4 sm:$0xff]  }
  0x17   :  { %429 = vmatmul.mubr.msk.bf16.vlgmr.msra.gmra.mrb[0].mxu0 %vm73_vm0, %v469_v3  ;;  %332 = vmatprep.subr.bf16.mxu1 %v473_v6  ;;  %v484_v13 = vld [vmem:[#allocation3 + $0x40] ss:$8 sps:$4 sm:$0xff]   ;;  %v487_v15 = vld [vmem:[#allocation3 + $0x50] ss:$8 sps:$4 sm:$0xff]   ;;  %v488_v16 = vld [vmem:[#allocation3 + $0x64] ss:$8 sps:$4 sm:$0xff]  }
  0x18   :  { %v490_v17 = vld [vmem:[#allocation3 + $0x60] ss:$8 sps:$4 sm:$0xff]   ;;  %v491_v18 = vld [vmem:[#allocation3 + $0x74] ss:$8 sps:$4 sm:$0xff]   ;;  %v493_v19 = vld [vmem:[#allocation3 + $0x70] ss:$8 sps:$4 sm:$0xff]  }
  0x19   :  { %v494_v20 = vld [vmem:[#allocation3 + $0x84] ss:$8 sps:$4 sm:$0xff]   ;;  %v496_v21 = vld [vmem:[#allocation3 + $0x80] ss:$8 sps:$4 sm:$0xff]   ;;  %v497_v22 = vld [vmem:[#allocation3 + $0x94] ss:$8 sps:$4 sm:$0xff]  }
  0x1a   :  { %333 = vmatpush1.bf16.msra.mxu1 %v475_v7  ;;  %v499_v23 = vld [vmem:[#allocation3 + $0x90] ss:$8 sps:$4 sm:$0xff]   ;;  %v500_v24 = vld [vmem:[#allocation3 + $0xa4] ss:$8 sps:$4 sm:$0xff]   ;;  %v502_v25 = vld [vmem:[#allocation3 + $0xa0] ss:$8 sps:$4 sm:$0xff]  }
  0x1b   :  { %334 = vmatprep.subr.bf16.mxu1 %v476_v8  ;;  %v503_v26 = vld [vmem:[#allocation3 + $0xb4] ss:$8 sps:$4 sm:$0xff]   ;;  %v505_v27 = vld [vmem:[#allocation3 + $0xb0] ss:$8 sps:$4 sm:$0xff]   ;;  %v506_v28 = vld [vmem:[#allocation3 + $0xc4] ss:$8 sps:$4 sm:$0xff]  }
  0x1c   :  { %v508_v29 = vld [vmem:[#allocation3 + $0xc0] ss:$8 sps:$4 sm:$0xff]   ;;  %v509_v30 = vld [vmem:[#allocation3 + $0xd4] ss:$8 sps:$4 sm:$0xff]   ;;  %v511_v31 = vld [vmem:[#allocation3 + $0xd0] ss:$8 sps:$4 sm:$0xff]  }
  0x1d   :  { %v512_v32 = vld [vmem:[#allocation3 + $0xe4] ss:$8 sps:$4 sm:$0xff]   ;;  %v514_v33 = vld [vmem:[#allocation3 + $0xe0] ss:$8 sps:$4 sm:$0xff]   ;;  %v515_v34 = vld [vmem:[#allocation3 + $0xf4] ss:$8 sps:$4 sm:$0xff]  }
  0x1e   :  { %335 = vmatpush1.bf16.msra.mxu1 %v478_v9  ;;  %v517_v35 = vld [vmem:[#allocation3 + $0xf0] ss:$8 sps:$4 sm:$0xff]   ;;  %v50_v38 = vsub.s32 0, %v49_v37  ;;  %v46_v39 = vld [vmem:[%s624_s2] sm:$0x3]  ;;  %v54_v40 = vsub.s32 1, %v49_v37 }
  0x1f   :  { %336 = vmatprep.subr.bf16.mxu1 %v479_v10  ;;  %v158_v57 = vld [vmem:[%s626_s4] sm:$0x3]  ;;  %vm416_vm1 = vcmask 130112   ;;  %vm419_vm2 = vcmask 122880  }
  0x20   :  { %v51_v41 = vrot.slane %v46_v39, %v50_v38  ;;  %v55_v42 = vrot.slane %v46_v39, %v54_v40  ;;  %v163_v58 = vrot.slane %v158_v57, %v50_v38  ;;  %v167_v59 = vrot.slane %v158_v57, %v54_v40  ;;  %v377_v60 = vld [vmem:[%s627_s5] sm:$0x3] }
  0x21   :  { %v382_v0 = vrot.slane %v377_v60, %v50_v38  ;;  %v386_v3 = vrot.slane %v377_v60, %v54_v40 }
  0x22   :  { %337 = vmatpush1.bf16.msra.mxu1 %v481_v11 }
  0x23   :  { %338 = vmatprep.subr.bf16.mxu1 %v482_v12 }
  0x26   :  { %339 = vmatpush1.bf16.msra.mxu1 %v484_v13 }
  0x27   :  { %340 = vmatprep.subr.bf16.mxu1 %v485_v14 }
  0x2a   :  { %341 = vmatpush1.bf16.msra.mxu1 %v487_v15 }
  0x2b   :  { %342 = vmatprep.subr.bf16.mxu1 %v488_v16 }
  0x2e   :  { %343 = vmatpush1.bf16.msra.mxu1 %v490_v17  ;;  %v406_v17 = vand.u32 127, %v48_v36 }
  0x2f   :  { %344 = vmatprep.subr.bf16.mxu1 %v491_v18 }
  0x30   :  { %v411_v18 = vadd.s32 4294967288, %v406_v17 }
  0x32   :  { %345 = vmatpush1.bf16.msra.mxu1 %v493_v19  ;;  %v400_v19 = vstv %s628_s6 }
  0x33   :  { %346 = vmatprep.subr.bf16.mxu1 %v494_v20 }
  0x36   :  { %347 = vmatpush1.bf16.msra.mxu1 %v496_v21  ;;  %v409_v21 = vsub.s32 %v406_v17, %v49_v37 }
  0x37   :  { %348 = vmatprep.subr.bf16.mxu1 %v497_v22 }
  0x3a   :  { %349 = vmatpush1.bf16.msra.mxu1 %v499_v23  ;;  %v414_v23 = vsub.s32 %v411_v18, %v49_v37 }
  0x3b   :  { %350 = vmatprep.subr.bf16.mxu1 %v500_v24 }
  0x3e   :  { %351 = vmatpush1.bf16.msra.mxu1 %v502_v25 }
  0x3f   :  { %352 = vmatprep.subr.bf16.mxu1 %v503_v26 }
  0x42   :  { %353 = vmatpush1.bf16.msra.mxu1 %v505_v27 }
  0x43   :  { %354 = vmatprep.subr.bf16.mxu1 %v506_v28 }
  0x46   :  { %355 = vmatpush1.bf16.msra.mxu1 %v508_v29 }
  0x47   :  { %356 = vmatprep.subr.bf16.mxu1 %v509_v30 }
  0x4a   :  { %357 = vmatpush1.bf16.msra.mxu1 %v511_v31 }
  0x4b   :  { %358 = vmatprep.subr.bf16.mxu1 %v512_v32 }
  0x4e   :  { %359 = vmatpush1.bf16.msra.mxu1 %v514_v33 }
  0x4f   :  { %360 = vmatprep.subr.bf16.mxu1 %v515_v34 }
  0x52   :  { %361 = vmatpush1.bf16.msra.mxu1 %v517_v35 }
  0xea   :  { %v111_v43 = vpop.f32.mrb[0].mxu0 }
  0xeb   :  { %v112_v44 = vadd.f32 %v111_v43, %v51_v41  ;;  %v113_v45 = vpop.f32.mrb[1].mxu0 }
  0xec   :  { %v114_v46 = vadd.f32 %v113_v45, %v55_v42  ;;  %v115_v47 = vpop.f32.mrb[2].mxu0 }
  0xed   :  { %v116_v48 = vadd.f32 %v115_v47, %v51_v41  ;;  %v117_v49 = vpop.f32.mrb[3].mxu0  ;;  %v120_v51 = vmax.f32 %v112_v44, 0.0 }
  0xee   :  { %v118_v50 = vadd.f32 %v117_v49, %v55_v42  ;;  %v121_v53 = vmax.f32 %v114_v46, 0.0 }
  0xef   :  { %v122_v52 = vmax.f32 %v116_v48, 0.0 }
  0xf0   :  { %v123_v54 = vmax.f32 %v118_v50, 0.0 }
  0xf1   :  { %v124_v55 = vpack.c.bf16 %v122_v52, %v120_v51 }
  0xf2   :  { %v125_v56 = vpack.c.bf16 %v123_v54, %v121_v53 }
  0xf4   :  { %362 = vmatprep.mubr.bf16.mxu1 %v125_v56 }
  0xf5   :  { %363 = vmatmul.mubr.bf16.vlgmr.msra.gmra.mrb[0].mxu1 %v124_v55 }
 0x1c8   :  { %v364_v61 = vpop.f32.mrb[0].mxu1 }
 0x1c9   :  { %v365_v62 = vadd.f32 %v364_v61, %v163_v58  ;;  %v366_v63 = vpop.f32.mrb[1].mxu1 }
 0x1ca   :  { %v367_v1 = vadd.f32 %v366_v63, %v167_v59  ;;  %v368_v2 = vpop.f32.mrb[2].mxu1 }
 0x1cb   :  { %v373_v4 = vmax.f32 %v365_v62, 0.0  ;;  %v369_v5 = vadd.f32 %v368_v2, %v163_v58  ;;  %v370_v6 = vpop.f32.mrb[3].mxu1 }
 0x1cc   :  { %v374_v7 = vmax.f32 %v367_v1, 0.0  ;;  %v371_v8 = vadd.f32 %v370_v6, %v167_v59 }
 0x1cd   :  { %v375_v9 = vmax.f32 %v369_v5, 0.0  ;;  %v389_v10 = vmul.f32 %v382_v0, %v373_v4 }
 0x1ce   :  { %v376_v11 = vmax.f32 %v371_v8, 0.0  ;;  %v390_v12 = vmul.f32 %v386_v3, %v374_v7 }
 0x1cf   :  { %v391_v13 = vmul.f32 %v382_v0, %v375_v9 }
 0x1d0   :  { %v392_v14 = vmul.f32 %v386_v3, %v376_v11  ;;  %v393_v15 = vadd.f32 %v390_v12, %v389_v10 }
 0x1d2   :  { %395 = vadd.xlane.f32.xlu0 %v393_v15  ;;  %v394_v16 = vadd.f32 %v392_v14, %v391_v13 }
 0x1d6   :  { %397 = vadd.xlane.f32.xlu0 %v394_v16 }
 0x25f   :  { %v396_v20 = vpop.xlane.xlu0 %395 }
 0x260   :  { %v401_v22 = vadd.f32 %v400_v19, %v396_v20 }
 0x262   :  { %v410_v26 = vrot.slane %v401_v22, %v409_v21 }
 0x263   :  { %v398_v24 = vpop.xlane.xlu0 %397 }
 0x264   :  { %v402_v25 = vadd.f32 %v400_v19, %v398_v24 }
 0x266   :  { %v415_v27 = vrot.slane %v402_v25, %v414_v23 }
 0x268   :  { %v417_v28 = vsel %vm416_vm1, %v415_v27, %v410_v26 }
 0x269   :  { %420 = vst.msk [vmem:[%s629_s7] sm:$0x1] %vm419_vm2, %v417_v28 }
 0x26a   :  { %425 = vsyncpa [#allocation4], 1 }

</bundles_post_ra>
